<compile_context>
chip_gen: v6e
topology: v6e:2x2x1
jax: 0.10.0
libtpu: 0.0.40
codegen_flags: <defaults>
</compile_context>

<pallas_src>
import functools

import jax
import jax.numpy as jnp
from jax.experimental import pallas as pl
from jax.experimental.pallas import tpu as pltpu

LN_EPS = 1e-5
LANE = 128


def _round_up(x, m):
    return (x + m - 1) // m * m


def _decoder_rescat_kernel(x_ref, w1_ref, b1_ref, g_ref, beta_ref,
                           w2x_ref, w2h_ref, b2_ref, o_ref):
    # x tile: [TM, in_features] in compute dtype (bf16 or f32).
    x = x_ref[...]

    # ---- MLP: Linear -> LayerNorm -> ReLU.  Matmul accumulates in f32,
    #      all LN / elementwise math stays in f32. ----
    h = jnp.dot(x, w1_ref[...], preferred_element_type=jnp.float32) + b1_ref[...]
    mean = jnp.mean(h, axis=-1, keepdims=True)
    var = jnp.mean(jnp.square(h - mean), axis=-1, keepdims=True)
    h = (h - mean) * jax.lax.rsqrt(var + LN_EPS)       # rsqrt -> EUP slot
    h = h * g_ref[...] + beta_ref[...]
    h = jnp.maximum(h, 0.0)

    # ---- fc(cat([x, h], -1)) == x @ W2_x + h @ W2_h + b2 (no in-kernel concat) ----
    out = (jnp.dot(x, w2x_ref[...], preferred_element_type=jnp.float32)
           + jnp.dot(h.astype(w2h_ref.dtype), w2h_ref[...],
                     preferred_element_type=jnp.float32)
           + b2_ref[...])
    o_ref[...] = out.astype(o_ref.dtype)


@functools.partial(jax.jit, static_argnames=("tile_m", "compute_dtype"))
def decoder_rescat(x, params, *, tile_m=512, compute_dtype=jnp.bfloat16):
    """x: [..., in_features] -> [..., out_features]."""
    w1, b1, gamma, beta, w2, b2 = params
    in_features = x.shape[-1]
    hidden = w1.shape[1]
    out_features = w2.shape[1]

    lead_shape = x.shape[:-1]
    x2d = x.reshape(-1, in_features)
    n = x2d.shape[0]

    # Sublane packing: bf16 rows pack in pairs -> tile rows multiple of 16.
    pack = 16 if jnp.dtype(compute_dtype).itemsize == 2 else 8
    tm = max(pack, (min(tile_m, _round_up(n, pack)) // pack) * pack)
    grid = (pl.cdiv(n, tm),)          # partial last block handled by Pallas masking

    # Lane-dense output: pad out_features up to a multiple of 128 lanes.
    out_pad = _round_up(out_features, LANE)

    # Cast matmul operands to the compute dtype; pad output columns only.
    x_c = x2d.astype(compute_dtype)
    w1_c = w1.astype(compute_dtype)
    # fc weight split along the concat axis: [x rows | mlp(x) rows].
    w2x_c = jnp.pad(w2[:in_features],
                    ((0, 0), (0, out_pad - out_features))).astype(compute_dtype)
    w2h_c = jnp.pad(w2[in_features:],
                    ((0, 0), (0, out_pad - out_features))).astype(compute_dtype)
    b2_p = jnp.pad(b2, (0, out_pad - out_features)).reshape(1, out_pad)
    b2_p = b2_p.astype(jnp.float32)
    b1_2d = b1.reshape(1, hidden).astype(jnp.float32)
    g_2d = gamma.reshape(1, hidden).astype(jnp.float32)
    be_2d = beta.reshape(1, hidden).astype(jnp.float32)

    full = lambda i: (0, 0)

    w_bytes = jnp.dtype(compute_dtype).itemsize
    rows = grid[0] * tm
    weight_elems = in_features * hidden + (in_features + hidden) * out_pad
    cost = pl.CostEstimate(
        flops=2 * rows * (in_features * hidden + (in_features + hidden) * out_pad),
        transcendentals=rows,  # one rsqrt per row
        bytes_accessed=(rows * in_features * w_bytes
                        + rows * out_pad * x.dtype.itemsize
                        + weight_elems * w_bytes),
    )

    out = pl.pallas_call(
        _decoder_rescat_kernel,
        out_shape=jax.ShapeDtypeStruct((n, out_pad), x.dtype),
        grid_spec=pltpu.PrefetchScalarGridSpec(
            num_scalar_prefetch=0,
            grid=grid,
            in_specs=[
                pl.BlockSpec((tm, in_features), lambda i: (i, 0)),      # x tile
                pl.BlockSpec((in_features, hidden), full),              # W1
                pl.BlockSpec((1, hidden), full),                        # b1
                pl.BlockSpec((1, hidden), full),                        # LN gamma
                pl.BlockSpec((1, hidden), full),                        # LN beta
                pl.BlockSpec((in_features, out_pad), full),             # W2_x
                pl.BlockSpec((hidden, out_pad), full),                  # W2_h
                pl.BlockSpec((1, out_pad), full),                       # b2
            ],
            out_specs=pl.BlockSpec((tm, out_pad), lambda i: (i, 0)),
        ),
        compiler_params=pltpu.CompilerParams(
            dimension_semantics=("parallel",)),
        cost_estimate=cost,
    )(x_c, w1_c, b1_2d, g_2d, be_2d, w2x_c, w2h_c, b2_p)

    out = out[:, :out_features]
    return out.reshape(*lead_shape, out_features)


def init_params(key, in_features, hidden_size, out_features):
    """Deterministic synthetic parameters (shapes match the PyTorch module)."""
    k1, k2, k3, k4 = jax.random.split(key, 4)
    s1 = 1.0 / jnp.sqrt(in_features)
    s2 = 1.0 / jnp.sqrt(hidden_size + in_features)
    # mlp.linear: Linear(in_features, hidden_size), stored as [in, hidden]
    w1 = jax.random.uniform(k1, (in_features, hidden_size), jnp.float32, -s1, s1)
    b1 = jax.random.uniform(k2, (hidden_size,), jnp.float32, -s1, s1)
    # mlp.layer_norm
    gamma = jnp.ones((hidden_size,), jnp.float32)
    beta = jnp.zeros((hidden_size,), jnp.float32)
    # fc: Linear(hidden_size + in_features, out_features), stored as
    # [in+hidden, out] with concat order [x, mlp(x)].
    w2 = jax.random.uniform(k3, (in_features + hidden_size, out_features),
                            jnp.float32, -s2, s2)
    b2 = jax.random.uniform(k4, (out_features,), jnp.float32, -s2, s2)
    return (w1, b1, gamma, beta, w2, b2)


def reference(x, params, compute_dtype=jnp.float32):
    """Pure-JAX reference matching the PyTorch forward (with matching casts)."""
    w1, b1, gamma, beta, w2, b2 = params
    cd = compute_dtype
    xc = x.astype(cd).astype(jnp.float32)
    h = xc @ w1.astype(cd).astype(jnp.float32) + b1
    mean = jnp.mean(h, axis=-1, keepdims=True)
    var = jnp.mean(jnp.square(h - mean), axis=-1, keepdims=True)
    h = (h - mean) / jnp.sqrt(var + LN_EPS) * gamma + beta
    h = jnp.maximum(h, 0.0)
    cat = jnp.concatenate([xc, h.astype(cd).astype(jnp.float32)], axis=-1)
    return cat @ w2.astype(cd).astype(jnp.float32) + b2


if __name__ == "__main__":
    key = jax.random.PRNGKey(0)
    batch, seq = 2, 8
    in_features, hidden_size, out_features = 32, 32, 60

    kx, kp = jax.random.split(key)
    x = jax.random.normal(kx, (batch, seq, in_features), jnp.float32)
    params = init_params(kp, in_features, hidden_size, out_features)

    # f32 compute path: strict check against the PyTorch-equivalent reference.
    out_f32 = jax.block_until_ready(
        decoder_rescat(x, params, tile_m=512, compute_dtype=jnp.float32))
    ref_f32 = reference(x, params, jnp.float32)
    assert out_f32.shape == (batch, seq, out_features), out_f32.shape
    assert jnp.allclose(out_f32, ref_f32, atol=1e-4, rtol=1e-4), \
        float(jnp.max(jnp.abs(out_f32 - ref_f32)))

    # bf16 matmul path (f32 accumulation, f32 LayerNorm): check against a
    # reference that applies the same bf16 casts.
    out_bf16 = jax.block_until_ready(
        decoder_rescat(x, params, tile_m=512, compute_dtype=jnp.bfloat16))
    ref_bf16 = reference(x, params, jnp.bfloat16)
    assert out_bf16.shape == (batch, seq, out_features), out_bf16.shape
    assert jnp.allclose(out_bf16, ref_bf16, atol=2e-2, rtol=2e-2), \
        float(jnp.max(jnp.abs(out_bf16 - ref_bf16)))

    print("KERNEL_OK")
</pallas_src>

<mosaic_0001>
module attributes {stable_mosaic.version = 11 : i64} {
  func.func @_decoder_rescat_kernel(%arg0: i32, %arg1: memref<16x32xf32, #tpu.memory_space<vmem>>, %arg2: memref<32x32xf32, #tpu.memory_space<vmem>>, %arg3: memref<1x32xf32, #tpu.memory_space<vmem>>, %arg4: memref<1x32xf32, #tpu.memory_space<vmem>>, %arg5: memref<1x32xf32, #tpu.memory_space<vmem>>, %arg6: memref<32x128xf32, #tpu.memory_space<vmem>>, %arg7: memref<32x128xf32, #tpu.memory_space<vmem>>, %arg8: memref<1x128xf32, #tpu.memory_space<vmem>>, %arg9: memref<16x128xf32, #tpu.memory_space<vmem>>) attributes {dimension_semantics = [#tpu.dimension_semantics<parallel>], iteration_bounds = array<i64: 1>, scalar_prefetch = 0 : i64, scratch_operands = 0 : i64, tpu.core_type = #tpu.core_type<tc>, window_params = [{transform_indices = @transform_0, window_bounds = array<i64: 16, 32>}, {pipeline_mode = #tpu.pipeline_mode<synchronous>, transform_indices = @transform_1, window_bounds = array<i64: 32, 32>}, {pipeline_mode = #tpu.pipeline_mode<synchronous>, transform_indices = @transform_2, window_bounds = array<i64: 1, 32>}, {pipeline_mode = #tpu.pipeline_mode<synchronous>, transform_indices = @transform_3, window_bounds = array<i64: 1, 32>}, {pipeline_mode = #tpu.pipeline_mode<synchronous>, transform_indices = @transform_4, window_bounds = array<i64: 1, 32>}, {pipeline_mode = #tpu.pipeline_mode<synchronous>, transform_indices = @transform_5, window_bounds = array<i64: 32, 128>}, {pipeline_mode = #tpu.pipeline_mode<synchronous>, transform_indices = @transform_6, window_bounds = array<i64: 32, 128>}, {pipeline_mode = #tpu.pipeline_mode<synchronous>, transform_indices = @transform_7, window_bounds = array<i64: 1, 128>}, {transform_indices = @transform_8, window_bounds = array<i64: 16, 128>}]} {
    %c0 = arith.constant 0 : index
    %c0_0 = arith.constant 0 : index
    %0 = vector.load %arg1[%c0, %c0_0] : memref<16x32xf32, #tpu.memory_space<vmem>>, vector<16x32xf32>
    %c0_1 = arith.constant 0 : index
    %c0_2 = arith.constant 0 : index
    %1 = vector.load %arg2[%c0_1, %c0_2] : memref<32x32xf32, #tpu.memory_space<vmem>>, vector<32x32xf32>
    %cst = arith.constant dense<0.000000e+00> : vector<16x32xf32>
    %2 = tpu.matmul %0, %1, %cst {dimension_numbers = #tpu.dot_dimension_numbers<[1], [0], [0], [1], [0, 0, 1, 1], [], []>} : vector<16x32xf32>, vector<32x32xf32>, vector<16x32xf32> -> vector<16x32xf32>
    %c0_3 = arith.constant 0 : index
    %c0_4 = arith.constant 0 : index
    %3 = vector.load %arg3[%c0_3, %c0_4] : memref<1x32xf32, #tpu.memory_space<vmem>>, vector<1x32xf32>
    %4 = vector.broadcast %3 : vector<1x32xf32> to vector<16x32xf32>
    %5 = arith.addf %2, %4 : vector<16x32xf32>
    %cst_5 = arith.constant dense<0.000000e+00> : vector<16xf32>
    %6 = vector.multi_reduction <add>, %5, %cst_5 [1] : vector<16x32xf32> to vector<16xf32>
    %7 = vector.shape_cast %6 : vector<16xf32> to vector<16x1xf32>
    %cst_6 = arith.constant 3.200000e+01 : f32
    %8 = vector.broadcast %cst_6 : f32 to vector<16x1xf32>
    %9 = arith.divf %7, %8 : vector<16x1xf32>
    %10 = vector.broadcast %9 : vector<16x1xf32> to vector<16x32xf32>
    %11 = arith.subf %5, %10 : vector<16x32xf32>
    %12 = arith.mulf %11, %11 : vector<16x32xf32>
    %cst_7 = arith.constant dense<0.000000e+00> : vector<16xf32>
    %13 = vector.multi_reduction <add>, %12, %cst_7 [1] : vector<16x32xf32> to vector<16xf32>
    %14 = vector.shape_cast %13 : vector<16xf32> to vector<16x1xf32>
    %cst_8 = arith.constant 3.200000e+01 : f32
    %15 = vector.broadcast %cst_8 : f32 to vector<16x1xf32>
    %16 = arith.divf %14, %15 : vector<16x1xf32>
    %17 = vector.broadcast %9 : vector<16x1xf32> to vector<16x32xf32>
    %18 = arith.subf %5, %17 : vector<16x32xf32>
    %cst_9 = arith.constant 9.99999974E-6 : f32
    %19 = vector.broadcast %cst_9 : f32 to vector<16x1xf32>
    %20 = arith.addf %16, %19 : vector<16x1xf32>
    %21 = math.rsqrt %20 : vector<16x1xf32>
    %22 = vector.broadcast %21 : vector<16x1xf32> to vector<16x32xf32>
    %23 = arith.mulf %18, %22 : vector<16x32xf32>
    %c0_10 = arith.constant 0 : index
    %c0_11 = arith.constant 0 : index
    %24 = vector.load %arg4[%c0_10, %c0_11] : memref<1x32xf32, #tpu.memory_space<vmem>>, vector<1x32xf32>
    %25 = vector.broadcast %24 : vector<1x32xf32> to vector<16x32xf32>
    %26 = arith.mulf %23, %25 : vector<16x32xf32>
    %c0_12 = arith.constant 0 : index
    %c0_13 = arith.constant 0 : index
    %27 = vector.load %arg5[%c0_12, %c0_13] : memref<1x32xf32, #tpu.memory_space<vmem>>, vector<1x32xf32>
    %28 = vector.broadcast %27 : vector<1x32xf32> to vector<16x32xf32>
    %29 = arith.addf %26, %28 : vector<16x32xf32>
    %cst_14 = arith.constant 0.000000e+00 : f32
    %30 = vector.broadcast %cst_14 : f32 to vector<16x32xf32>
    %31 = arith.maximumf %29, %30 : vector<16x32xf32>
    %c0_15 = arith.constant 0 : index
    %c0_16 = arith.constant 0 : index
    %32 = vector.load %arg6[%c0_15, %c0_16] : memref<32x128xf32, #tpu.memory_space<vmem>>, vector<32x128xf32>
    %cst_17 = arith.constant dense<0.000000e+00> : vector<16x128xf32>
    %33 = tpu.matmul %0, %32, %cst_17 {dimension_numbers = #tpu.dot_dimension_numbers<[1], [0], [0], [1], [0, 0, 1, 1], [], []>} : vector<16x32xf32>, vector<32x128xf32>, vector<16x128xf32> -> vector<16x128xf32>
    %c0_18 = arith.constant 0 : index
    %c0_19 = arith.constant 0 : index
    %34 = vector.load %arg7[%c0_18, %c0_19] : memref<32x128xf32, #tpu.memory_space<vmem>>, vector<32x128xf32>
    %cst_20 = arith.constant dense<0.000000e+00> : vector<16x128xf32>
    %35 = tpu.matmul %31, %34, %cst_20 {dimension_numbers = #tpu.dot_dimension_numbers<[1], [0], [0], [1], [0, 0, 1, 1], [], []>} : vector<16x32xf32>, vector<32x128xf32>, vector<16x128xf32> -> vector<16x128xf32>
    %36 = arith.addf %33, %35 : vector<16x128xf32>
    %c0_21 = arith.constant 0 : index
    %c0_22 = arith.constant 0 : index
    %37 = vector.load %arg8[%c0_21, %c0_22] : memref<1x128xf32, #tpu.memory_space<vmem>>, vector<1x128xf32>
    %38 = vector.broadcast %37 : vector<1x128xf32> to vector<16x128xf32>
    %39 = arith.addf %36, %38 : vector<16x128xf32>
    %c0_23 = arith.constant 0 : index
    %c0_24 = arith.constant 0 : index
    %40 = vector.load %arg9[%c0_23, %c0_24] : memref<16x128xf32, #tpu.memory_space<vmem>>, vector<16x128xf32>
    tpu.vector_store %arg9[%c0_23, %c0_24], %39 {strides = array<i32>} : memref<16x128xf32, #tpu.memory_space<vmem>>, vector<16x128xf32>,
    return
  }
  func.func @transform_0(%arg0: i32) -> (i32, i32) {
    %c0_i32 = arith.constant 0 : i32
    %c0_i32_0 = arith.constant 0 : i32
    return %arg0, %c0_i32 : i32, i32
  }
  func.func @transform_1(%arg0: i32) -> (i32, i32) {
    %c0_i32 = arith.constant 0 : i32
    %c0_i32_0 = arith.constant 0 : i32
    %c0_i32_1 = arith.constant 0 : i32
    return %c0_i32, %c0_i32_0 : i32, i32
  }
  func.func @transform_2(%arg0: i32) -> (i32, i32) {
    %c0_i32 = arith.constant 0 : i32
    %c0_i32_0 = arith.constant 0 : i32
    %c0_i32_1 = arith.constant 0 : i32
    return %c0_i32, %c0_i32_0 : i32, i32
  }
  func.func @transform_3(%arg0: i32) -> (i32, i32) {
    %c0_i32 = arith.constant 0 : i32
    %c0_i32_0 = arith.constant 0 : i32
    %c0_i32_1 = arith.constant 0 : i32
    return %c0_i32, %c0_i32_0 : i32, i32
  }
  func.func @transform_4(%arg0: i32) -> (i32, i32) {
    %c0_i32 = arith.constant 0 : i32
    %c0_i32_0 = arith.constant 0 : i32
    %c0_i32_1 = arith.constant 0 : i32
    return %c0_i32, %c0_i32_0 : i32, i32
  }
  func.func @transform_5(%arg0: i32) -> (i32, i32) {
    %c0_i32 = arith.constant 0 : i32
    %c0_i32_0 = arith.constant 0 : i32
    %c0_i32_1 = arith.constant 0 : i32
    return %c0_i32, %c0_i32_0 : i32, i32
  }
  func.func @transform_6(%arg0: i32) -> (i32, i32) {
    %c0_i32 = arith.constant 0 : i32
    %c0_i32_0 = arith.constant 0 : i32
    %c0_i32_1 = arith.constant 0 : i32
    return %c0_i32, %c0_i32_0 : i32, i32
  }
  func.func @transform_7(%arg0: i32) -> (i32, i32) {
    %c0_i32 = arith.constant 0 : i32
    %c0_i32_0 = arith.constant 0 : i32
    %c0_i32_1 = arith.constant 0 : i32
    return %c0_i32, %c0_i32_0 : i32, i32
  }
  func.func @transform_8(%arg0: i32) -> (i32, i32) {
    %c0_i32 = arith.constant 0 : i32
    %c0_i32_0 = arith.constant 0 : i32
    return %arg0, %c0_i32 : i32, i32
  }
}

</mosaic_0001>

<bundles_post_ra>
// kernel: decoder_rescat.1
= control target key start
LH: loop header
LB: loop body
LE: loop exit
PB: predicated region body
PF: predicated region fallthrough
CT: control target
= control target key end

     0   :  { %vm42_vm0 = vcmask 261120   ;;  %s530_s1 = inlined_call_operand.vmem [shape: f32[32,32], index: 1, kind: input, shape index: {}]   ;;  %s531_s0 = inlined_call_operand.vmem [shape: f32[16,32], index: 0, kind: input, shape index: {}]   ;;  %s532_s2 = inlined_call_operand.vmem [shape: f32[1,32], index: 2, kind: input, shape index: {}]   ;;  %s533_s5 = inlined_call_operand.vmem [shape: f32[32,128], index: 5, kind: input, shape index: {}]   ;;  %s534_s6 = inlined_call_operand.vmem [shape: f32[32,128], index: 6, kind: input, shape index: {}]   ;;  %s535_s3 = inlined_call_operand.vmem [shape: f32[1,32], index: 3, kind: input, shape index: {}]   ;;  %s536_s4 = inlined_call_operand.vmem [shape: f32[1,32], index: 4, kind: input, shape index: {}]   ;;  %s537_s7 = inlined_call_operand.vmem [shape: f32[1,128], index: 7, kind: input, shape index: {}]   ;;  %s538_s8 = inlined_call_operand.vmem [shape: f32[16,128], index: 8, kind: output, shape index: {}]  }
   0x1   :  { %v34_v0 = vld [vmem:[%s530_s1 + $0x18] sm:$0xff]  ;;  %v33_v1 = vld [vmem:[%s530_s1 + $0x10] sm:$0xff]  ;;  %v29_v2 = vld [vmem:[%s531_s0] sm:$0xff] }
   0x2   :  { %378 = vmatprep.subr.mxu0 %v34_v0  ;;  %v32_v3 = vld [vmem:[%s530_s1 + $0x8] sm:$0xff]  ;;  %386 = vmatprep.mubr.msk.f32.mxu0 %vm42_vm0, %v29_v2  ;;  %v31_v4 = vld [vmem:[%s530_s1] sm:$0xff]  ;;  %v174_v23 = vld [vmem:[%s533_s5 + $0x18] sm:$0xff] }
   0x3   :  { %379 = vmatpush3.msra.mxu0 %v34_v0  ;;  %v30_v5 = vld [vmem:[%s531_s0 + $0x8] sm:$0xff]  ;;  %v350_v7 = vld [vmem:[%s532_s2] ss:$0 sm:$0xff]  ;;  %v178_v24 = vld [vmem:[%s534_s6 + $0x18] sm:$0xff] }
   0x4   :  { %380 = vmatprep.subr.mxu0 %v33_v1  ;;  %v173_v25 = vld [vmem:[%s533_s5 + $0x10] sm:$0xff]  ;;  %389 = vmatprep.subr.mxu1 %v178_v24  ;;  %v172_v27 = vld [vmem:[%s533_s5 + $0x8] sm:$0xff]  ;;  %v171_v29 = vld [vmem:[%s533_s5] sm:$0xff] }
   0x5   :  { %381 = vmatpush3.msra.mxu0 %v33_v1  ;;  %v177_v26 = vld [vmem:[%s534_s6 + $0x10] sm:$0xff]  ;;  %390 = vmatpush3.msra.mxu1 %v178_v24  ;;  %v176_v28 = vld [vmem:[%s534_s6 + $0x8] sm:$0xff]  ;;  %v175_v30 = vld [vmem:[%s534_s6] sm:$0xff] }
   0x6   :  { %382 = vmatprep.subr.mxu0 %v32_v3  ;;  %391 = vmatprep.subr.mxu1 %v177_v26  ;;  %v353_v38 = vld [vmem:[%s535_s3] ss:$0 sm:$0xff] }
   0x7   :  { %383 = vmatpush3.msra.mxu0 %v32_v3  ;;  %392 = vmatpush3.msra.mxu1 %v177_v26  ;;  %v354_v40 = vld [vmem:[%s536_s4] ss:$0 sm:$0xff] }
   0x8   :  { %384 = vmatprep.subr.mxu0 %v31_v4  ;;  %393 = vmatprep.subr.mxu1 %v176_v28  ;;  %v359_v51 = vld [vmem:[%s537_s7] ss:$0 sm:$0xff] }
   0x9   :  { %385 = vmatpush3.msra.mxu0 %v31_v4  ;;  %394 = vmatpush3.msra.mxu1 %v176_v28 }
   0xa   :  { %387 = vmatmul.mubr.msk.f32.vlgmr.msra.gmra.mxu0 %vm42_vm0, %v30_v5  ;;  %400 = vmatprep.subr.mxu0 %v174_v23 }
   0xb   :  { %408 = vmatprep.mubr.msk.f32.mxu0 %vm42_vm0, %v29_v2  ;;  %401 = vmatpush3.msra.mxu0 %v174_v23 }
   0xc   :  { %402 = vmatprep.subr.mxu0 %v173_v25  ;;  %395 = vmatprep.subr.mxu1 %v175_v30 }
   0xd   :  { %403 = vmatpush3.msra.mxu0 %v173_v25  ;;  %396 = vmatpush3.msra.mxu1 %v175_v30 }
   0xe   :  { %404 = vmatprep.subr.mxu0 %v172_v27 }
   0xf   :  { %405 = vmatpush3.msra.mxu0 %v172_v27 }
  0x10   :  { %406 = vmatprep.subr.mxu0 %v171_v29 }
  0x11   :  { %407 = vmatpush3.msra.mxu0 %v171_v29 }
  0x12   :  { %409 = vmatmul.mubr.msk.f32.vlgmr.msra.gmra.mxu0 %vm42_vm0, %v30_v5 }
  0xca   :  { %v388_v6 = vpop.f32.mrf.mxu0 }
  0xcb   :  { %v121_v10 = vadd.f32 %v388_v6, %v350_v7 }
  0xcc   :  { %v115_v8 = vpop.f32.mrf.mxu0 }
  0xcd   :  { %v116_v9 = vadd.f32 %v350_v7, %v115_v8  ;;  %v127_v12 = vsel %vm42_vm0, %v121_v10, 0.0 }
  0xcf   :  { %v124_v11 = vsel %vm42_vm0, %v116_v9, 0.0 }
  0xd0   :  { %125 = vadd.xlane.f32.xlu0 %v124_v11 }
  0xd2   :  { %v410_v49 = vpop.f32.mrf.mxu0 }
  0xd4   :  { %128 = vadd.xlane.f32.xlu0 %v127_v12  ;;  %v326_v53 = vpop.f32.mrf.mxu0 }
 0x159   :  { %v126_v13 = vpop.xlane.xlu0 %125 }
 0x15a   :  { %v131_v14 = vmul.f32 0.03125, %v126_v13 }
 0x15c   :  { %v133_v15 = vsub.f32 %v116_v9, %v131_v14 }
 0x15d   :  { %v129_v16 = vpop.xlane.xlu0 %128 }
 0x15e   :  { %v132_v17 = vmul.f32 0.03125, %v129_v16  ;;  %v135_v18 = vmul.f32 %v133_v15, %v133_v15 }
 0x160   :  { %v134_v19 = vsub.f32 %v121_v10, %v132_v17  ;;  %v137_v20 = vsel %vm42_vm0, %v135_v18, 0.0 }
 0x161   :  { %138 = vadd.xlane.f32.xlu1 %v137_v20 }
 0x162   :  { %v136_v21 = vmul.f32 %v134_v19, %v134_v19 }
 0x164   :  { %v140_v22 = vsel %vm42_vm0, %v136_v21, 0.0 }
 0x165   :  { %141 = vadd.xlane.f32.xlu1 %v140_v22 }
 0x1ea   :  { %v139_v31 = vpop.xlane.xlu1 %138 }
 0x1eb   :  { %v143_v32 = vmul.f32 0.03125, %v139_v31 }
 0x1ed   :  { %v145_v33 = vadd.f32 1e-05, %v143_v32 }
 0x1ee   :  { %v142_v34 = vpop.xlane.xlu1 %141 }
 0x1ef   :  { %411 = vrsqrt.f32 %v145_v33  ;;  %v144_v35 = vmul.f32 0.03125, %v142_v34 }
 0x1f1   :  { %v146_v36 = vadd.f32 1e-05, %v144_v35 }
 0x1f3   :  { %413 = vrsqrt.f32 %v146_v36 }
 0x1fc   :  { %v412_v37 = vpop.eup %411 }
 0x1fd   :  { %v149_v39 = vmul.f32 %v412_v37, %v133_v15 }
 0x1ff   :  { %v158_v41 = vmul.f32 %v353_v38, %v149_v39 }
 0x200   :  { %v414_v42 = vpop.eup %413 }
 0x201   :  { %v150_v43 = vmul.f32 %v414_v42, %v134_v19  ;;  %v167_v44 = vadd.f32 %v354_v40, %v158_v41 }
 0x203   :  { %v159_v45 = vmul.f32 %v353_v38, %v150_v43  ;;  %v169_v46 = vmax.f32 %v167_v44, 0.0 }
 0x205   :  { %v168_v47 = vadd.f32 %v354_v40, %v159_v45  ;;  %397 = vmatprep.mubr.msk.f32.mxu1 %vm42_vm0, %v169_v46 }
 0x207   :  { %v170_v48 = vmax.f32 %v168_v47, 0.0 }
 0x209   :  { %398 = vmatmul.mubr.msk.f32.vlgmr.msra.gmra.mxu1 %vm42_vm0, %v170_v48 }
 0x2c9   :  { %v399_v50 = vpop.f32.mrf.mxu1 }
 0x2ca   :  { %v332_v52 = vadd.f32 %v410_v49, %v399_v50 }
 0x2cb   :  { %v251_v54 = vpop.f32.mrf.mxu1 }
 0x2cc   :  { %v343_v55 = vadd.f32 %v359_v51, %v332_v52  ;;  %v327_v56 = vadd.f32 %v326_v53, %v251_v54 }
 0x2ce   :  { %345 = vst [vmem:[%s538_s8 + $0x8] sm:$0xff] %v343_v55  ;;  %v342_v57 = vadd.f32 %v359_v51, %v327_v56 }
 0x2d0   :  { %344 = vst [vmem:[%s538_s8] sm:$0xff] %v342_v57 }

</bundles_post_ra>
